<compile_context>
chip_gen: v5e
topology: v5e:2x2
jax: 0.10.0
libtpu: 0.0.40
codegen_flags: <defaults>
</compile_context>

<pallas_src>
import functools

import jax
import jax.numpy as jnp
import numpy as np
from jax.experimental import pallas as pl
from jax.experimental.pallas import tpu as pltpu

WINDOW_SIZES = (3, 4, 5)
N_FILTERS = (16, 16, 16)
_NEG = -1e30          # additive mask value (finite -> no inf-inf NaNs)


def _round_up(x, m):
    return (x + m - 1) // m * m


def _vmem_budget_bytes():
    """Per-generation scoped-VMEM budget (leaves headroom for compiler scratch)."""
    phys = 64 * 1024 * 1024                 # assume the tightest generation (v7x)
    try:
        info = pltpu.get_tpu_info()
        phys = int(getattr(info, "vmem_capacity_bytes", phys) or phys)
    except Exception:
        pass
    # 48 MiB on 64-MiB v7x, 96 MiB on 128-MiB v5e/v6e.
    return min((phys * 3) // 4, 100 * 1024 * 1024)


def cnn_classifier_kernel(x_ref, wm_ref, bm_ref, mask_ref, gw_ref, gb_ref,
                          o_ref, *, max_ws, b_tile, l_pad, f_pad):
    """One batch tile: merged conv + ReLU + max-over-time + linear + log-softmax."""
    m = b_tile * l_pad
    x = x_ref[...]                                   # (M, D) bf16
    x32 = x.astype(jnp.float32)                      # rolled view (32-bit rotate)

    # Full-width conv for all window sizes at once:
    #   acc[p, :] = sum_i  x[p + i, :] @ Wm[i]       (Wm zero-padded per window)
    # The shift is applied to the *input* with an XLU sublane roll
    # (roll by m - i  <=>  row p reads x[(p + i) % m]); rows that wrap across
    # sample boundaries only land on positions masked below.
    acc = jnp.dot(x, wm_ref[0], preferred_element_type=jnp.float32)      # (M, F_pad)
    for i in range(1, max_ws):
        xi = pltpu.roll(x32, shift=m - i, axis=0).astype(x.dtype)
        acc += jnp.dot(xi, wm_ref[i], preferred_element_type=jnp.float32)

    feat = jnp.maximum(acc + bm_ref[...], 0.0)       # conv bias + ReLU (dropout = id)
    # (M, F_pad) -> (b_tile, l_pad, F_pad); mask invalid time positions, pool.
    feat = feat.reshape(b_tile, l_pad, f_pad) + mask_ref[...]
    h = jnp.max(feat, axis=1)                        # (b_tile, F_pad)

    logits = jnp.dot(h.astype(gw_ref.dtype), gw_ref[...],
                     preferred_element_type=jnp.float32) + gb_ref[...]   # (b_tile, C_pad)

    # log-softmax over the lane-padded class axis; padded classes carry a
    # -1e30 bias -> exp underflows to 0 and they do not affect the normalizer.
    zmax = jnp.max(logits, axis=-1, keepdims=True)
    z = logits - zmax
    lse = jnp.log(jnp.sum(jnp.exp(z), axis=-1, keepdims=True))
    o_ref[...] = (z - lse).astype(o_ref.dtype)


def cnn_classifier_forward(tokens, params, *, window_sizes=WINDOW_SIZES,
                           n_filters=N_FILTERS, b_tile=None):
    emb = params["emb"]
    D = emb.shape[1]
    B, L = tokens.shape
    max_ws = max(window_sizes)
    sum_f = sum(n_filters)
    n_classes = params["gb"].shape[-1]

    l_torch = max(L, max_ws)             # PyTorch pads the sequence up to max(ws)
    l_pad = _round_up(l_torch, 8)        # sublane-aligned time axis
    f_pad = _round_up(sum_f, 128)        # lane-dense merged filter axis
    c_pad = _round_up(n_classes, 128)    # lane-dense class axis
    assert l_pad >= l_torch              # wrap-around-roll safety (see mask below)

    vmem_budget = _vmem_budget_bytes()

    # Batch tile: one double-buffered bf16 activation block targets ~budget/8
    # per buffer; m_tile is capped at 4096 rows so the f32 intermediates the
    # compiler materializes (acc/x32/feat, ~0.5-1.5 KB/row) stay bounded.
    if b_tile is None:
        bytes_per_sample = l_pad * D * 2                    # bf16
        b_tile = (vmem_budget // 8) // bytes_per_sample
        b_tile = max(8, (b_tile // 8) * 8)
        b_tile = min(b_tile, max(8, ((4096 // l_pad) // 8) * 8))
    assert b_tile % 8 == 0
    b_tile = min(b_tile, _round_up(B, 8))
    # v7x megacore: make sure the "parallel" axis has >= 2 steps when B allows.
    b_pad_min = _round_up(B, 8)
    if b_pad_min >= 16 and b_pad_min // b_tile < 2:
        b_tile = _round_up(b_pad_min // 2, 8)
    b_pad = _round_up(B, b_tile)
    grid = (b_pad // b_tile,)
    m_tile = b_tile * l_pad

    # ---- embedding: gather THEN cast (table itself is never re-cast), then pad
    # batch/time and flatten to a 2-D (B_pad*L_pad, D) slab so no in-kernel
    # relayout is needed.
    x = params["emb"][tokens].astype(jnp.bfloat16)          # (B, L, D)
    x = jnp.pad(x, ((0, b_pad - B), (0, l_pad - L), (0, 0)))
    x2d = x.reshape(b_pad * l_pad, D)

    # ---- merge the three conv weights into one lane-padded slab per shift.
    wm = jnp.zeros((max_ws, D, f_pad), jnp.float32)
    bm = jnp.zeros((1, f_pad), jnp.float32)
    limits = np.full((f_pad,), l_pad, np.int32)   # padded cols: never masked (features are 0)
    off = 0
    for ws, nf in zip(window_sizes, n_filters):
        # every position whose window crosses a sample boundary must be masked,
        # otherwise the wrap-around roll would leak rows from the next sample.
        assert l_torch - ws + 1 <= l_pad - (ws - 1)
        wm = wm.at[:ws, :, off:off + nf].set(params[f"conv{ws}_w"])
        bm = bm.at[:, off:off + nf].set(params[f"conv{ws}_b"])
        limits[off:off + nf] = l_torch - ws + 1   # valid conv positions for this window
        off += nf
    wm = wm.astype(jnp.bfloat16)

    # additive time-position mask (per window width), applied before max-pool
    pos = np.arange(l_pad, dtype=np.int32)[:, None]          # (l_pad, 1)
    mask = jnp.asarray(np.where(pos < limits[None, :], 0.0, _NEG), jnp.float32)

    # ---- lane-padded generator; padded class columns pre-masked via the bias.
    gw = jnp.zeros((f_pad, c_pad), jnp.float32)
    gw = gw.at[:sum_f, :n_classes].set(params["gw"]).astype(jnp.bfloat16)
    gb = jnp.full((1, c_pad), _NEG, jnp.float32)
    gb = gb.at[:, :n_classes].set(params["gb"])

    kernel = functools.partial(cnn_classifier_kernel, max_ws=max_ws,
                               b_tile=b_tile, l_pad=l_pad, f_pad=f_pad)

    flops = 2 * b_pad * l_pad * D * f_pad * max_ws + 2 * b_pad * f_pad * c_pad
    bytes_accessed = (x2d.size * 2 + b_pad * c_pad * 4 + wm.size * 2
                      + bm.size * 4 + mask.size * 4 + gw.size * 2 + gb.size * 4)

    out = pl.pallas_call(
        kernel,
        out_shape=jax.ShapeDtypeStruct((b_pad, c_pad), jnp.float32),
        grid=grid,
        in_specs=[
            pl.BlockSpec((m_tile, D), lambda b: (b, 0)),            # activations
            pl.BlockSpec((max_ws, D, f_pad), lambda b: (0, 0, 0)),  # merged conv W
            pl.BlockSpec((1, f_pad), lambda b: (0, 0)),             # merged conv bias
            pl.BlockSpec((l_pad, f_pad), lambda b: (0, 0)),         # time-position mask
            pl.BlockSpec((f_pad, c_pad), lambda b: (0, 0)),         # generator W
            pl.BlockSpec((1, c_pad), lambda b: (0, 0)),             # generator bias (+class mask)
        ],
        out_specs=pl.BlockSpec((b_tile, c_pad), lambda b: (b, 0)),
        compiler_params=pltpu.CompilerParams(
            dimension_semantics=("parallel",),
            vmem_limit_bytes=int(vmem_budget)),
        cost_estimate=pl.CostEstimate(
            flops=int(flops), transcendentals=int(b_pad * c_pad),
            bytes_accessed=int(bytes_accessed)),
    )(x2d, wm, bm, mask, gw, gb)

    return out[:B, :n_classes]


def init_params(key, vocab, word_vec_dim, n_classes, window_sizes, n_filters):
    keys = jax.random.split(key, 3 + 2 * len(window_sizes))
    params = {"emb": 0.1 * jax.random.normal(keys[0], (vocab, word_vec_dim),
                                             jnp.float32)}
    for i, (ws, nf) in enumerate(zip(window_sizes, n_filters)):
        # PyTorch Conv2d weight is (F, 1, ws, D); stored here as (ws, D, F).
        params[f"conv{ws}_w"] = 0.1 * jax.random.normal(
            keys[1 + 2 * i], (ws, word_vec_dim, nf), jnp.float32)
        params[f"conv{ws}_b"] = 0.1 * jax.random.normal(
            keys[2 + 2 * i], (1, nf), jnp.float32)
    sum_f = sum(n_filters)
    # PyTorch Linear weight is (n_classes, sum_f); stored pre-transposed.
    params["gw"] = 0.1 * jax.random.normal(keys[-2], (sum_f, n_classes), jnp.float32)
    params["gb"] = 0.1 * jax.random.normal(keys[-1], (1, n_classes), jnp.float32)
    return params


def reference_forward(tokens, params, *, window_sizes=WINDOW_SIZES,
                      n_filters=N_FILTERS):
    """Pure-JAX f32 reference matching the PyTorch eval-mode forward."""
    x = params["emb"][tokens]                               # (B, L, D)
    B, L, D = x.shape
    max_ws = max(window_sizes)
    if L < max_ws:
        x = jnp.concatenate([x, jnp.zeros((B, max_ws - L, D), x.dtype)], axis=1)
    feats = []
    for ws, nf in zip(window_sizes, n_filters):
        w, b = params[f"conv{ws}_w"], params[f"conv{ws}_b"]
        l_out = x.shape[1] - ws + 1
        conv = sum(jnp.einsum("bld,df->blf", x[:, i:i + l_out], w[i])
                   for i in range(ws))
        feats.append(jnp.max(jax.nn.relu(conv + b), axis=1))
    h = jnp.concatenate(feats, axis=-1)
    logits = h @ params["gw"] + params["gb"]
    return jax.nn.log_softmax(logits, axis=-1)


if __name__ == "__main__":
    vocab, word_vec_dim, n_classes = 32, 32, 8
    B, L = 16, 8

    key = jax.random.PRNGKey(0)
    kp, kx = jax.random.split(key)
    params = init_params(kp, vocab, word_vec_dim, n_classes,
                         WINDOW_SIZES, N_FILTERS)
    tokens = jax.random.randint(kx, (B, L), 0, vocab, dtype=jnp.int32)

    # heuristic tile: B=16 -> b_tile=8, grid=(2,) (>=2 steps for v7x megacore)
    y = cnn_classifier_forward(tokens, params)
    jax.block_until_ready(y)

    y_ref = reference_forward(tokens, params)
    err = float(jnp.max(jnp.abs(y - y_ref)))
    assert y.shape == (B, n_classes)
    assert bool(jnp.all(jnp.isfinite(y)))
    assert err < 5e-2, f"max |kernel - reference| = {err}"
    print("KERNEL_OK")
</pallas_src>

<mosaic_0001>
module attributes {stable_mosaic.version = 11 : i64} {
  func.func @cnn_classifier_kernel(%arg0: i32, %arg1: memref<64x32xbf16, #tpu.memory_space<vmem>>, %arg2: memref<5x32x128xbf16, #tpu.memory_space<vmem>>, %arg3: memref<1x128xf32, #tpu.memory_space<vmem>>, %arg4: memref<8x128xf32, #tpu.memory_space<vmem>>, %arg5: memref<128x128xbf16, #tpu.memory_space<vmem>>, %arg6: memref<1x128xf32, #tpu.memory_space<vmem>>, %arg7: memref<8x128xf32, #tpu.memory_space<vmem>>) attributes {dimension_semantics = [#tpu.dimension_semantics<parallel>], iteration_bounds = array<i64: 2>, scalar_prefetch = 0 : i64, scratch_operands = 0 : i64, tpu.core_type = #tpu.core_type<tc>, window_params = [{transform_indices = @transform_0, window_bounds = array<i64: 64, 32>}, {pipeline_mode = #tpu.pipeline_mode<synchronous>, transform_indices = @transform_1, window_bounds = array<i64: 5, 32, 128>}, {pipeline_mode = #tpu.pipeline_mode<synchronous>, transform_indices = @transform_2, window_bounds = array<i64: 1, 128>}, {pipeline_mode = #tpu.pipeline_mode<synchronous>, transform_indices = @transform_3, window_bounds = array<i64: 8, 128>}, {pipeline_mode = #tpu.pipeline_mode<synchronous>, transform_indices = @transform_4, window_bounds = array<i64: 128, 128>}, {pipeline_mode = #tpu.pipeline_mode<synchronous>, transform_indices = @transform_5, window_bounds = array<i64: 1, 128>}, {transform_indices = @transform_6, window_bounds = array<i64: 8, 128>}]} {
    %c0 = arith.constant 0 : index
    %c0_0 = arith.constant 0 : index
    %0 = vector.load %arg1[%c0, %c0_0] : memref<64x32xbf16, #tpu.memory_space<vmem>>, vector<64x32xbf16>
    %1 = arith.extf %0 : vector<64x32xbf16> to vector<64x32xf32>
    %c0_1 = arith.constant 0 : index
    %c0_2 = arith.constant 0 : index
    %c0_3 = arith.constant 0 : index
    %2 = vector.load %arg2[%c0_1, %c0_2, %c0_3] : memref<5x32x128xbf16, #tpu.memory_space<vmem>>, vector<1x32x128xbf16>
    %3 = vector.shape_cast %2 : vector<1x32x128xbf16> to vector<32x128xbf16>
    %cst = arith.constant dense<0.000000e+00> : vector<64x128xf32>
    %4 = tpu.matmul %0, %3, %cst {dimension_numbers = #tpu.dot_dimension_numbers<[1], [0], [0], [1], [0, 0, 1, 1], [], []>} : vector<64x32xbf16>, vector<32x128xbf16>, vector<64x128xf32> -> vector<64x128xf32>
    %c63_i32 = arith.constant 63 : i32
    %5 = tpu.dynamic_rotate %1 by %c63_i32 dim 0 : vector<64x32xf32>, i32 -> vector<64x32xf32>
    %6 = arith.truncf %5 : vector<64x32xf32> to vector<64x32xbf16>
    %c1 = arith.constant 1 : index
    %c0_4 = arith.constant 0 : index
    %c0_5 = arith.constant 0 : index
    %7 = vector.load %arg2[%c1, %c0_4, %c0_5] : memref<5x32x128xbf16, #tpu.memory_space<vmem>>, vector<1x32x128xbf16>
    %8 = vector.shape_cast %7 : vector<1x32x128xbf16> to vector<32x128xbf16>
    %cst_6 = arith.constant dense<0.000000e+00> : vector<64x128xf32>
    %9 = tpu.matmul %6, %8, %cst_6 {dimension_numbers = #tpu.dot_dimension_numbers<[1], [0], [0], [1], [0, 0, 1, 1], [], []>} : vector<64x32xbf16>, vector<32x128xbf16>, vector<64x128xf32> -> vector<64x128xf32>
    %10 = arith.addf %4, %9 : vector<64x128xf32>
    %c62_i32 = arith.constant 62 : i32
    %11 = tpu.dynamic_rotate %1 by %c62_i32 dim 0 : vector<64x32xf32>, i32 -> vector<64x32xf32>
    %12 = arith.truncf %11 : vector<64x32xf32> to vector<64x32xbf16>
    %c2 = arith.constant 2 : index
    %c0_7 = arith.constant 0 : index
    %c0_8 = arith.constant 0 : index
    %13 = vector.load %arg2[%c2, %c0_7, %c0_8] : memref<5x32x128xbf16, #tpu.memory_space<vmem>>, vector<1x32x128xbf16>
    %14 = vector.shape_cast %13 : vector<1x32x128xbf16> to vector<32x128xbf16>
    %cst_9 = arith.constant dense<0.000000e+00> : vector<64x128xf32>
    %15 = tpu.matmul %12, %14, %cst_9 {dimension_numbers = #tpu.dot_dimension_numbers<[1], [0], [0], [1], [0, 0, 1, 1], [], []>} : vector<64x32xbf16>, vector<32x128xbf16>, vector<64x128xf32> -> vector<64x128xf32>
    %16 = arith.addf %10, %15 : vector<64x128xf32>
    %c61_i32 = arith.constant 61 : i32
    %17 = tpu.dynamic_rotate %1 by %c61_i32 dim 0 : vector<64x32xf32>, i32 -> vector<64x32xf32>
    %18 = arith.truncf %17 : vector<64x32xf32> to vector<64x32xbf16>
    %c3 = arith.constant 3 : index
    %c0_10 = arith.constant 0 : index
    %c0_11 = arith.constant 0 : index
    %19 = vector.load %arg2[%c3, %c0_10, %c0_11] : memref<5x32x128xbf16, #tpu.memory_space<vmem>>, vector<1x32x128xbf16>
    %20 = vector.shape_cast %19 : vector<1x32x128xbf16> to vector<32x128xbf16>
    %cst_12 = arith.constant dense<0.000000e+00> : vector<64x128xf32>
    %21 = tpu.matmul %18, %20, %cst_12 {dimension_numbers = #tpu.dot_dimension_numbers<[1], [0], [0], [1], [0, 0, 1, 1], [], []>} : vector<64x32xbf16>, vector<32x128xbf16>, vector<64x128xf32> -> vector<64x128xf32>
    %22 = arith.addf %16, %21 : vector<64x128xf32>
    %c60_i32 = arith.constant 60 : i32
    %23 = tpu.dynamic_rotate %1 by %c60_i32 dim 0 : vector<64x32xf32>, i32 -> vector<64x32xf32>
    %24 = arith.truncf %23 : vector<64x32xf32> to vector<64x32xbf16>
    %c4 = arith.constant 4 : index
    %c0_13 = arith.constant 0 : index
    %c0_14 = arith.constant 0 : index
    %25 = vector.load %arg2[%c4, %c0_13, %c0_14] : memref<5x32x128xbf16, #tpu.memory_space<vmem>>, vector<1x32x128xbf16>
    %26 = vector.shape_cast %25 : vector<1x32x128xbf16> to vector<32x128xbf16>
    %cst_15 = arith.constant dense<0.000000e+00> : vector<64x128xf32>
    %27 = tpu.matmul %24, %26, %cst_15 {dimension_numbers = #tpu.dot_dimension_numbers<[1], [0], [0], [1], [0, 0, 1, 1], [], []>} : vector<64x32xbf16>, vector<32x128xbf16>, vector<64x128xf32> -> vector<64x128xf32>
    %28 = arith.addf %22, %27 : vector<64x128xf32>
    %c0_16 = arith.constant 0 : index
    %c0_17 = arith.constant 0 : index
    %29 = vector.load %arg3[%c0_16, %c0_17] : memref<1x128xf32, #tpu.memory_space<vmem>>, vector<1x128xf32>
    %30 = vector.broadcast %29 : vector<1x128xf32> to vector<64x128xf32>
    %31 = arith.addf %28, %30 : vector<64x128xf32>
    %cst_18 = arith.constant 0.000000e+00 : f32
    %32 = vector.broadcast %cst_18 : f32 to vector<64x128xf32>
    %33 = arith.maximumf %31, %32 : vector<64x128xf32>
    %34 = vector.shape_cast %33 : vector<64x128xf32> to vector<8x8x128xf32>
    %c0_19 = arith.constant 0 : index
    %c0_20 = arith.constant 0 : index
    %35 = vector.load %arg4[%c0_19, %c0_20] : memref<8x128xf32, #tpu.memory_space<vmem>>, vector<8x128xf32>
    %36 = vector.shape_cast %35 : vector<8x128xf32> to vector<1x8x128xf32>
    %37 = vector.broadcast %36 : vector<1x8x128xf32> to vector<8x8x128xf32>
    %38 = arith.addf %34, %37 : vector<8x8x128xf32>
    %cst_21 = arith.constant dense<0xFF800000> : vector<8x128xf32>
    %39 = vector.multi_reduction <maximumf>, %38, %cst_21 [1] : vector<8x8x128xf32> to vector<8x128xf32>
    %40 = arith.truncf %39 : vector<8x128xf32> to vector<8x128xbf16>
    %c0_22 = arith.constant 0 : index
    %c0_23 = arith.constant 0 : index
    %41 = vector.load %arg5[%c0_22, %c0_23] : memref<128x128xbf16, #tpu.memory_space<vmem>>, vector<128x128xbf16>
    %cst_24 = arith.constant dense<0.000000e+00> : vector<8x128xf32>
    %42 = tpu.matmul %40, %41, %cst_24 {dimension_numbers = #tpu.dot_dimension_numbers<[1], [0], [0], [1], [0, 0, 1, 1], [], []>} : vector<8x128xbf16>, vector<128x128xbf16>, vector<8x128xf32> -> vector<8x128xf32>
    %c0_25 = arith.constant 0 : index
    %c0_26 = arith.constant 0 : index
    %43 = vector.load %arg6[%c0_25, %c0_26] : memref<1x128xf32, #tpu.memory_space<vmem>>, vector<1x128xf32>
    %44 = vector.broadcast %43 : vector<1x128xf32> to vector<8x128xf32>
    %45 = arith.addf %42, %44 : vector<8x128xf32>
    %cst_27 = arith.constant dense<0xFF800000> : vector<8xf32>
    %46 = vector.multi_reduction <maximumf>, %45, %cst_27 [1] : vector<8x128xf32> to vector<8xf32>
    %47 = vector.shape_cast %46 : vector<8xf32> to vector<8x1xf32>
    %48 = vector.broadcast %47 : vector<8x1xf32> to vector<8x128xf32>
    %49 = arith.subf %45, %48 : vector<8x128xf32>
    %50 = math.exp %49 : vector<8x128xf32>
    %cst_28 = arith.constant dense<0.000000e+00> : vector<8xf32>
    %51 = vector.multi_reduction <add>, %50, %cst_28 [1] : vector<8x128xf32> to vector<8xf32>
    %52 = vector.shape_cast %51 : vector<8xf32> to vector<8x1xf32>
    %53 = math.log %52 : vector<8x1xf32>
    %54 = vector.broadcast %53 : vector<8x1xf32> to vector<8x128xf32>
    %55 = arith.subf %49, %54 : vector<8x128xf32>
    %c0_29 = arith.constant 0 : index
    %c0_30 = arith.constant 0 : index
    %56 = vector.load %arg7[%c0_29, %c0_30] : memref<8x128xf32, #tpu.memory_space<vmem>>, vector<8x128xf32>
    tpu.vector_store %arg7[%c0_29, %c0_30], %55 {strides = array<i32>} : memref<8x128xf32, #tpu.memory_space<vmem>>, vector<8x128xf32>,
    return
  }
  func.func @transform_0(%arg0: i32) -> (i32, i32) {
    %c0_i32 = arith.constant 0 : i32
    %c0_i32_0 = arith.constant 0 : i32
    return %arg0, %c0_i32 : i32, i32
  }
  func.func @transform_1(%arg0: i32) -> (i32, i32, i32) {
    %c0_i32 = arith.constant 0 : i32
    %c0_i32_0 = arith.constant 0 : i32
    %c0_i32_1 = arith.constant 0 : i32
    %c0_i32_2 = arith.constant 0 : i32
    return %c0_i32, %c0_i32_0, %c0_i32_1 : i32, i32, i32
  }
  func.func @transform_2(%arg0: i32) -> (i32, i32) {
    %c0_i32 = arith.constant 0 : i32
    %c0_i32_0 = arith.constant 0 : i32
    %c0_i32_1 = arith.constant 0 : i32
    return %c0_i32, %c0_i32_0 : i32, i32
  }
  func.func @transform_3(%arg0: i32) -> (i32, i32) {
    %c0_i32 = arith.constant 0 : i32
    %c0_i32_0 = arith.constant 0 : i32
    %c0_i32_1 = arith.constant 0 : i32
    return %c0_i32, %c0_i32_0 : i32, i32
  }
  func.func @transform_4(%arg0: i32) -> (i32, i32) {
    %c0_i32 = arith.constant 0 : i32
    %c0_i32_0 = arith.constant 0 : i32
    %c0_i32_1 = arith.constant 0 : i32
    return %c0_i32, %c0_i32_0 : i32, i32
  }
  func.func @transform_5(%arg0: i32) -> (i32, i32) {
    %c0_i32 = arith.constant 0 : i32
    %c0_i32_0 = arith.constant 0 : i32
    %c0_i32_1 = arith.constant 0 : i32
    return %c0_i32, %c0_i32_0 : i32, i32
  }
  func.func @transform_6(%arg0: i32) -> (i32, i32) {
    %c0_i32 = arith.constant 0 : i32
    %c0_i32_0 = arith.constant 0 : i32
    return %arg0, %c0_i32 : i32, i32
  }
}

</mosaic_0001>

<bundles_post_ra>
// kernel: tpu_custom_call.1
= control target key start
LH: loop header
LB: loop body
LE: loop exit
PB: predicated region body
PF: predicated region fallthrough
CT: control target
= control target key end

     0   :  { %11 = vsyncpa [#allocation3], 0  ;;  %s1766_s0 = inlined_call_operand.vmem [shape: bf16[128,32], index: 0, kind: input, shape index: {}]   ;;  %s1767_s1 = inlined_call_operand.vmem [shape: bf16[5,32,128], index: 1, kind: input, shape index: {}]   ;;  %s1768_s2 = inlined_call_operand.vmem [shape: f32[1,128], index: 2, kind: input, shape index: {}]   ;;  %s1769_s3 = inlined_call_operand.hbm [shape: f32[8,128], index: 3, kind: input, shape index: {}]   ;;  %s1770_s4 = inlined_call_operand.hbm [shape: bf16[128,128], index: 4, kind: input, shape index: {}]   ;;  %s1771_s5 = inlined_call_operand.vmem [shape: f32[1,128], index: 5, kind: input, shape index: {}]   ;;  %s1772_s6 = inlined_call_operand.hbm [shape: f32[16,128], index: 6, kind: output, shape index: {}]  }
   0x1   :  { %12 = vsyncpa [#allocation6], 0 }
   0x2   :  { %13 = vsyncpa [#allocation4], 0 }
   0x3   :  { %15 = vsyncpa [#allocation4 + $0x1], 0  ;;  %s1431_s21 = smov 0   ;;  %s1433_s22 = smov 0  }
   0x4   :  { %s1435_s23 = smov 0   ;;  %s1437_s24 = smov 0  }
   0x5 LB: > { %s1452_s25 = sadd.s32 4294967295, %s1390_s24   ;;  %s1027_s26 = sadd.s32 4294967294, %s1390_s24   ;;  %s1390_s24 = sphi %s1437_s24, %s1779_s24   ;;  %s1386_s23 = sphi %s1435_s23, %s1778_s23   ;;  %s1382_s22 = sphi %s1433_s22, %s1777_s22   ;;  %s1378_s21 = sphi %s1431_s21, %s1776_s21  }
   0x6   : > { %s1456_s27 = sadd.s32 1, %s1390_s24   ;;  %s159_s28 = sadd.s32 1, %s1386_s23 }
   0x7   : > { %s156_s29 = ssub.s32 %s1390_s24, %s1456_s27  ;;  %p169_p0 = scmp.ne.s32.totalorder %s1386_s23, %s1382_s22 }
   0x8   : > { %p157_p1 = scmp.eq.s32.totalorder %s156_s29, 0  ;;  %p170_p2 = scmp.eq.s32.totalorder %s1452_s25, 1 }
   0x9   : > { %p175_p3 = scmp.ne.s32.totalorder %s1382_s22, %s1378_s21  ;;  %p176_p4 = scmp.eq.s32.totalorder %s1027_s26, 1 }
   0xa   : > { %s1467_s30 = scalar_select %p157_p1, %s1386_s23, %s159_s28  }
   0xb   : > { %p1469_p5 = por %p170_p2, %p169_p0  ;;  %p1473_p6 = por %p176_p4, %p175_p3 }
   0xc   : > { %p1028_p7 = scmp.ge.s32.totalorder %s1390_s24, 1  ;;  %p183_p8 = scmp.lt.s32.totalorder %s1390_s24, 3 }
   0xd   : > { %p1213_p9 = scmp.eq.s32.totalorder %s1452_s25, 0  ;;  %s201_s12 = sshll.u32 %s1769_s3, 4  ;;  %s202_s12 = int_to_ptr.hbm [resolvable:$true] %s201_s12 }
   0xe   : > { %p1480_p10 = pnand %p1028_p7, %p183_p8  ;;  %s1392_s13 = smov [#allocation2]  }
   0xf   : > { %s203_s14 = sshll.u32 %s1392_s13, 4  ;;  %s212_s17 = sshll.u32 %s1770_s4, 4  ;;  %s204_s14 = int_to_ptr.vmem [resolvable:$true] %s203_s14  ;;  %s213_s17 = int_to_ptr.hbm [resolvable:$true] %s212_s17 }
  0x10   : > { %p1202_p11 = pneg %p1480_p10  ;;  %s1393_s18 = smov [#allocation5]  }
  0x11   : > { %s214_s19 = sshll.u32 %s1393_s18, 4  ;;  %s1394_s20 = smov 64   ;;  %s215_s19 = int_to_ptr.vmem [resolvable:$true] %s214_s19 }
  0x12   : > { %p1203_p12 = pnand %p1213_p9, %p1202_p11  ;;  %s1395_s26 = smov 4  }
  0x13   : > { %242 = sbr.rel (%p1480_p10) target bundleno = 678 (0x2a6), region = 44 }
  0x14   : > { %1205 = dma.hbm_to_vmem [thread:$0]  (!%p1203_p12), %s202_s12, 128, %s204_s14, [#allocation3]  }
  0x15   : > { %1208 = dma.hbm_to_vmem [thread:$0]  (!%p1203_p12), %s213_s17, 1024, %s215_s19, [#allocation6], %s1394_s20, %s1394_s20, %s1395_s26  }
  0x18   : > { %1365 = dma.done.wait (%p1213_p9), [#allocation3], 128  }
  0x19   : > { %1367 = vsyncadd (%p1213_p9), [#allocation3], 4294967168 }
  0x1a   : > { %1369 = dma.done.wait (%p1213_p9), [#allocation6], 1024  }
  0x1b   : > { %1371 = vsyncadd (%p1213_p9), [#allocation6], 4294966272  ;;  %s1505_s28 = sshll.u32 %s1452_s25, 3  ;;  %v313_v0 = vlaneseq  ;;  %v1173_v2 = vld [vmem:[%s1767_s1 + $0x18] sm:$0xff]  ;;  %v1171_v3 = vld [vmem:[%s1767_s1 + $0x8] sm:$0xff]  ;;  %vm345_vm1 = vcmask 261120  }
  0x1c   : > { %p279_p13 = scmp.lt.s32.totalorder %s1505_s28, 15  ;;  %1188 = vmatpush.bf16.msra.mxu2 %v1173_v2  ;;  %437 = vmatpush.bf16.msra.mxu1 %v1171_v3  ;;  %v1172_v6 = vld [vmem:[%s1767_s1 + $0x10] sm:$0xff]  ;;  %v1170_v7 = vld [vmem:[%s1767_s1] sm:$0xff]  ;;  %v1175_v12 = vld [vmem:[%s1767_s1 + $0x28] sm:$0xff]  ;;  %vm842_vm5 = vcmask 1041409   ;;  %vm844_vm6 = vcmask 1042434   ;;  %s941_s11 = scalar_lea.hbm %s1772_s6, %s1505_s28 }
  0x1d   : > { %v1514_v1 = vshrl.u32 %v313_v0, 7  ;;  %1189 = vmatpush.bf16.msra.mxu3 %v1173_v2  ;;  %364 = vmatpush.bf16.msra.mxu0 %v1173_v2  ;;  %v1177_v20 = vld [vmem:[%s1767_s1 + $0x38] sm:$0xff]  ;;  %v1179_v28 = vld [vmem:[%s1767_s1 + $0x48] sm:$0xff]  ;;  %v1174_v31 = vld [vmem:[%s1767_s1 + $0x20] sm:$0xff]  ;;  %vm846_vm7 = vcmask 1043459   ;;  %vm848_vm8 = vcmask 1044484  }
  0x1e   : > { %s280_s29 = scalar_select %p279_p13, %s1505_s28, 15  ;;  %v1176_v37 = vld [vmem:[%s1767_s1 + $0x30] sm:$0xff]  ;;  %v1178_v40 = vld [vmem:[%s1767_s1 + $0x40] sm:$0xff]  ;;  %vm850_vm9 = vcmask 1045509   ;;  %vm852_vm10 = vcmask 1046534   ;;  %vm854_vm11 = vcmask 1047559  }
  0x1f   : > { %vm315_vm0 = vcmp.lt.s32.totalorder %v1514_v1, 7  ;;  %vm555_vm2 = vcmp.lt.s32.totalorder %v1514_v1, 5  ;;  %vm642_vm3 = vcmp.lt.s32.totalorder %v1514_v1, 4  ;;  %vm468_vm4 = vcmp.lt.s32.totalorder %v1514_v1, 6  ;;  %s275_s26 = sand.u32 1, %s1382_s22   ;;  %s945_s25 = sshll.u32 %s941_s11, 4  ;;  %s946_s25 = int_to_ptr.hbm [resolvable:$true] %s945_s25 }
  0x20   : > { %s1037_s9 = sshll.u32 %s280_s29, 2  ;;  %1190 = vmatpush.bf16.msra.mxu2 %v1172_v6  ;;  %438 = vmatpush.bf16.msra.mxu1 %v1170_v7  ;;  %s1035_s29 = sshll.u32 %s275_s26, 3 }
  0x21   : > { %s1512_s12 = scalar_lea.vmem %s1766_s0, %s1037_s9  ;;  %1191 = vmatpush.bf16.msra.mxu3 %v1172_v6  ;;  %365 = vmatpush.bf16.msra.mxu0 %v1172_v6  ;;  %s277_s13 = scalar_lea.vmem [#allocation7], %s1035_s29 }
  0x22   : > { %v287_v4 = vld [vmem:[%s1512_s12 + $0x8] sm:$0xff]   ;;  %v289_v5 = vld [vmem:[%s1512_s12 + $0x10] sm:$0xff]   ;;  %v285_v11 = vld [vmem:[%s1512_s12] sm:$0xff]   ;;  %s943_s14 = sshll.u32 %s277_s13, 4  ;;  %s931_s15 = scalar_lea.sflag [#allocation4], %s275_s26  ;;  %s944_s14 = int_to_ptr.vmem [resolvable:$true] %s943_s14 }
  0x23   : > { %v1530_v8 = vunpack.c.l.bf16 %v287_v4  ;;  %v1532_v9 = vunpack.c.h.bf16 %v287_v4  ;;  %v1534_v10 = vunpack.c.l.bf16 %v289_v5  ;;  %v291_v13 = vld [vmem:[%s1512_s12 + $0x18] sm:$0xff]   ;;  %v1542_v14 = vunpack.c.l.bf16 %v285_v11  ;;  %v1166_v21 = vld [vmem:[%s1512_s12] sm:$0xff]  ;;  %v1167_v51 = vld [vmem:[%s1512_s12 + $0x8] sm:$0xff]  ;;  %s1334_s16 = sshra.s32 %s946_s25, 4  ;;  %s1340_s28 = scalar_lea.hbm %s1772_s6, 16  ;;  %s1335_s16 = int_to_ptr.hbm [resolvable:$true] %s1334_s16 }
  0x24   : > { %v1544_v15 = vunpack.c.h.bf16 %v285_v11  ;;  %v1549_v19 = vunpack.c.l.bf16 %v291_v13  ;;  %v1555_v22 = vunpack.c.h.bf16 %v291_v13  ;;  %516 = vmatpush.bf16.msrb.mxu2 %v1175_v12  ;;  %v1573_v33 = vunpack.c.h.bf16 %v289_v5  ;;  %1078 = vmatmul.msk.bf16.vlgmr.msra.gmra.mxu1 %vm345_vm1, %v1166_v21  ;;  %v1168_v5 = vld [vmem:[%s1512_s12 + $0x10] sm:$0xff]  ;;  %s1336_s17 = scalar_lea.hbm %s1335_s16, 8  ;;  %p1341_p3 = scmp.lt.s32.totalorder %s1335_s16, %s1772_s6 }
  0x25   : > { %v307_v16 = vrot.slane %v1530_v8, 1  ;;  %v308_v17 = vrot.slane %v1532_v9, 1  ;;  %v309_v18 = vrot.slane %v1534_v10, 1  ;;  %v305_v23 = vrot.slane %v1542_v14, 1  ;;  %603 = vmatpush.bf16.msrb.mxu3 %v1177_v20  ;;  %690 = vmatpush.bf16.msrb.mxu0 %v1179_v28  ;;  %p1337_p0 = scmp.ne.s32.totalorder %s1335_s16, %s1336_s17  ;;  %p1342_p4 = scmp.lt.s32.totalorder %s1340_s28, %s1336_s17 }
  0x26   : > { %v306_v24 = vrot.slane %v1544_v15, 1  ;;  %v311_v27 = vrot.slane %v1549_v19, 1  ;;  %v312_v30 = vrot.slane %v1555_v22, 1  ;;  %v310_v41 = vrot.slane %v1573_v33, 1 }
  0x27   : > { %v319_v25 = vsel %vm315_vm0, %v308_v17, %v309_v18  ;;  %v320_v26 = vsel %vm315_vm0, %v307_v16, %v308_v17  ;;  %v547_v44 = vrot.slane %v1542_v14, 3  ;;  %v548_v45 = vrot.slane %v1544_v15, 3  ;;  %p1338_p1 = pnand %p1337_p0, %p1469_p5  ;;  %p1343_p7 = por %p1342_p4, %p1341_p3 }
  0x28   : > { %v325_v29 = vpack.c.bf16 %v319_v25, %v320_v26  ;;  %v321_v32 = vsel %vm315_vm0, %v306_v24, %v307_v16  ;;  %v322_v34 = vsel %vm315_vm0, %v305_v23, %v306_v24  ;;  %v316_v35 = vsel %vm315_vm0, %v311_v27, %v312_v30  ;;  %517 = vmatpush.bf16.msrb.mxu2 %v1174_v31 }
  0x29   : > { %v323_v36 = vsel %vm315_vm0, %v312_v30, %v305_v23  ;;  %v324_v39 = vpack.c.bf16 %v321_v32, %v322_v34  ;;  %604 = vmatpush.bf16.msrb.mxu3 %v1176_v37  ;;  %691 = vmatpush.bf16.msrb.mxu0 %v1178_v40  ;;  %v317_v42 = vsel %vm315_vm0, %v310_v41, %v311_v27  ;;  %v549_v46 = vrot.slane %v1530_v8, 3  ;;  %p1339_p2 = pneg %p1338_p1 }
  0x2a   : > { %1051 = vmatmul.msk.bf16.vlgmr.msra.gmra.mxu2 %vm345_vm1, %v325_v29  ;;  %v327_v38 = vpack.c.bf16 %v323_v36, %v316_v35  ;;  %v318_v43 = vsel %vm315_vm0, %v309_v18, %v310_v41  ;;  %v634_v47 = vrot.slane %v1542_v14, 4  ;;  %v635_v48 = vrot.slane %v1544_v15, 4 }
  0x2b   : > { %1050 = vmatmul.msk.bf16.vlgmr.msra.gmra.mxu0 %vm345_vm1, %v324_v39  ;;  %v636_v49 = vrot.slane %v1530_v8, 4  ;;  %v326_v50 = vpack.c.bf16 %v317_v42, %v318_v43  ;;  %v561_v52 = vsel %vm555_vm2, %v548_v45, %v549_v46  ;;  %v562_v53 = vsel %vm555_vm2, %v547_v44, %v548_v45  ;;  %p1344_p8 = pnand %p1343_p7, %p1339_p2 }
  0x2c   : > { %1053 = vmatmul.msk.bf16.vlgmr.msra.gmra.mxu3 %vm345_vm1, %v327_v38  ;;  %v649_v55 = vsel %vm642_vm3, %v634_v47, %v635_v48  ;;  %v564_v56 = vpack.c.bf16 %v561_v52, %v562_v53  ;;  %v460_v58 = vrot.slane %v1542_v14, 2  ;;  %v461_v59 = vrot.slane %v1544_v15, 2 }
  0x2d   : > { %v648_v54 = vsel %vm642_vm3, %v635_v48, %v636_v49  ;;  %v462_v60 = vrot.slane %v1530_v8, 2  ;;  %v550_v63 = vrot.slane %v1532_v9, 3  ;;  %v551_v0 = vrot.slane %v1534_v10, 3 }
  0x2e   : > { %v651_v57 = vpack.c.bf16 %v648_v54, %v649_v55  ;;  %v475_v62 = vsel %vm468_vm4, %v460_v58, %v461_v59  ;;  %v637_v2 = vrot.slane %v1532_v9, 4  ;;  %v638_v3 = vrot.slane %v1534_v10, 4 }
  0x2f   : > { %v474_v61 = vsel %vm468_vm4, %v461_v59, %v462_v60  ;;  %v559_v6 = vsel %vm555_vm2, %v550_v63, %v551_v0  ;;  %v560_v7 = vsel %vm555_vm2, %v549_v46, %v550_v63  ;;  %v463_v15 = vrot.slane %v1532_v9, 2  ;;  %v1169_v9 = vld [vmem:[%s1512_s12 + $0x18] sm:$0xff]  ;;  %v1707_v63 = vld [vmem:[%s1768_s2] ss:$0 sm:$0xff] }
  0x30   : > { %v477_v4 = vpack.c.bf16 %v474_v61, %v475_v62  ;;  %v646_v8 = vsel %vm642_vm3, %v637_v2, %v638_v3  ;;  %v647_v11 = vsel %vm642_vm3, %v636_v49, %v637_v2  ;;  %v565_v12 = vpack.c.bf16 %v559_v6, %v560_v7 }
  0x31   : > { %v652_v13 = vpack.c.bf16 %v646_v8, %v647_v11  ;;  %v464_v16 = vrot.slane %v1534_v10, 2  ;;  %v473_v18 = vsel %vm468_vm4, %v462_v60, %v463_v15  ;;  %v552_v20 = vrot.slane %v1573_v33, 3 }
  0x32   : > { %v553_v21 = vrot.slane %v1549_v19, 3  ;;  %v639_v23 = vrot.slane %v1573_v33, 4  ;;  %v640_v24 = vrot.slane %v1549_v19, 4  ;;  %v465_v31 = vrot.slane %v1573_v33, 2 }
  0x33   : > { %v472_v17 = vsel %vm468_vm4, %v463_v15, %v464_v16  ;;  %v558_v26 = vsel %vm555_vm2, %v551_v0, %v552_v20  ;;  %v466_v32 = vrot.slane %v1549_v19, 2  ;;  %v554_v36 = vrot.slane %v1555_v22, 3 }
  0x34   : > { %1079 = vmatmul.msk.bf16.gmra.mxu1 %vm345_vm1, %v1167_v51  ;;  %v478_v25 = vpack.c.bf16 %v472_v17, %v473_v18  ;;  %v557_v10 = vsel %vm555_vm2, %v552_v20, %v553_v21  ;;  %v644_v27 = vsel %vm642_vm3, %v639_v23, %v640_v24  ;;  %v645_v28 = vsel %vm642_vm3, %v638_v3, %v639_v23 }
  0x35   : > { %v566_v29 = vpack.c.bf16 %v557_v10, %v558_v26  ;;  %v653_v30 = vpack.c.bf16 %v644_v27, %v645_v28  ;;  %v470_v34 = vsel %vm468_vm4, %v465_v31, %v466_v32  ;;  %v471_v35 = vsel %vm468_vm4, %v464_v16, %v465_v31  ;;  %v1187_v10 = vld [vmem:[#allocation5 + $0x38] sm:$0xff] }
  0x36   : > { %v641_v37 = vrot.slane %v1555_v22, 4  ;;  %v479_v38 = vpack.c.bf16 %v470_v34, %v471_v35  ;;  %v556_v39 = vsel %vm555_vm2, %v553_v21, %v554_v36  ;;  %v563_v33 = vsel %vm555_vm2, %v554_v36, %v547_v44  ;;  %906 = vmatpush.bf16.msrb.mxu1 %v1187_v10 }
  0x37   : > { %v567_v41 = vpack.c.bf16 %v563_v33, %v556_v39  ;;  %v467_v43 = vrot.slane %v1555_v22, 2  ;;  %v1186_v39 = vld [vmem:[#allocation5 + $0x30] sm:$0xff] }
  0x38   : > { %v643_v19 = vsel %vm642_vm3, %v640_v24, %v641_v37  ;;  %v650_v40 = vsel %vm642_vm3, %v641_v37, %v634_v47 }
  0x39   : > { %v654_v42 = vpack.c.bf16 %v650_v40, %v643_v19  ;;  %v469_v44 = vsel %vm468_vm4, %v466_v32, %v467_v43  ;;  %v476_v45 = vsel %vm468_vm4, %v467_v43, %v460_v58 }
  0x3a   : > { %1052 = vmatmul.msk.bf16.gmra.mxu2 %vm345_vm1, %v326_v50  ;;  %v480_v14 = vpack.c.bf16 %v476_v45, %v469_v44  ;;  %907 = vmatpush.bf16.msrb.mxu1 %v1186_v39  ;;  %v1185_v45 = vld [vmem:[#allocation5 + $0x28] sm:$0xff] }
  0x3b   : > { %1126 = vmatmul.msk.bf16.vlgmr.msrb.gmra.mxu0 %vm345_vm1, %v651_v57 }
  0x3c   : > { %1110 = vmatmul.msk.bf16.vlgmr.msrb.gmra.mxu3 %vm345_vm1, %v564_v56 }
  0x3e   : > { %908 = vmatpush.bf16.msrb.mxu1 %v1185_v45 }
  0x44   : > { %1080 = vmatmul.msk.bf16.gmra.mxu1 %vm345_vm1, %v1168_v5 }
  0x4a   : > { %1094 = vmatmul.msk.bf16.vlgmr.msrb.gmra.mxu2 %vm345_vm1, %v477_v4 }
  0x4b   : > { %1127 = vmatmul.msk.bf16.gmra.mxu0 %vm345_vm1, %v652_v13  ;;  %v1710_v13 = vld [vmem:[#allocation2] sm:$0xff] }
  0x4c   : > { %1111 = vmatmul.msk.bf16.gmra.mxu3 %vm345_vm1, %v565_v12 }
  0x54   : > { %1081 = vmatmul.msk.bf16.gmra.mxu1 %vm345_vm1, %v1169_v9 }
  0x5a   : > { %1095 = vmatmul.msk.bf16.gmra.mxu2 %vm345_vm1, %v478_v25 }
  0x5b   : > { %1128 = vmatmul.msk.bf16.gmra.mxu0 %vm345_vm1, %v653_v30 }
  0x5c   : > { %1112 = vmatmul.msk.bf16.gmra.mxu3 %vm345_vm1, %v566_v29 }
  0x6a   : > { %1096 = vmatmul.msk.bf16.gmra.mxu2 %vm345_vm1, %v479_v38 }
  0x6b   : > { %1129 = vmatmul.msk.bf16.gmra.mxu0 %vm345_vm1, %v654_v42 }
  0x6c   : > { %1113 = vmatmul.msk.bf16.gmra.mxu3 %vm345_vm1, %v567_v41 }
  0x7a   : > { %1097 = vmatmul.msk.bf16.gmra.mxu2 %vm345_vm1, %v480_v14 }
  0xa1   : > { %v440_v52 = vpop.f32.mrf.mxu1 }
  0xa8   : > { %v367_v47 = vpop.f32.mrf.mxu0 }
  0xa9   : > { %v442_v55 = vpop.f32.mrf.mxu1  ;;  %v441_v57 = vadd.f32 %v440_v52, %v367_v47 }
  0xad   : > { %v372_v46 = vpop.f32.mrf.mxu2 }
  0xaf   : > { %v1698_v48 = vpop.f32.mrf.mxu3 }
  0xb0   : > { %v369_v51 = vpop.f32.mrf.mxu0 }
  0xb1   : > { %v445_v61 = vpop.f32.mrf.mxu1  ;;  %v443_v2 = vadd.f32 %v442_v55, %v369_v51 }
  0xb2   : > { %v446_v16 = vadd.f32 %v445_v61, %v372_v46 }
  0xb5   : > { %v374_v49 = vpop.f32.mrf.mxu2 }
  0xb7   : > { %v1700_v50 = vpop.f32.mrf.mxu3 }
  0xb8   : > { %v693_v54 = vpop.f32.mrf.mxu0 }
  0xb9   : > { %v447_v11 = vpop.f32.mrf.mxu1 }
  0xba   : > { %v448_v31 = vadd.f32 %v447_v11, %v374_v49  ;;  %v1183_v11 = vld [vmem:[#allocation5 + $0x18] sm:$0xff] }
  0xbd   : > { %v377_v53 = vpop.f32.mrf.mxu2 }
  0xbf   : > { %v606_v22 = vpop.f32.mrf.mxu3 }
  0xc0   : > { %v695_v59 = vpop.f32.mrf.mxu0 }
  0xc1   : > { %v450_v30 = vpop.f32.mrf.mxu1 }
  0xc2   : > { %v451_v47 = vadd.f32 %v450_v30, %v377_v53 }
  0xc5   : > { %v1702_v56 = vpop.f32.mrf.mxu2 }
  0xc7   : > { %v608_v1 = vpop.f32.mrf.mxu3 }
  0xc8   : > { %v698_v7 = vpop.f32.mrf.mxu0 }
  0xcd   : > { %v519_v58 = vpop.f32.mrf.mxu2 }
  0xce   : > { %v539_v60 = vadd.f32 %v519_v58, %v441_v57 }
  0xcf   : > { %v611_v5 = vpop.f32.mrf.mxu3 }
  0xd0   : > { %v626_v62 = vadd.f32 %v606_v22, %v539_v60  ;;  %v700_v27 = vpop.f32.mrf.mxu0  ;;  %v452_v22 = vpop.f32.mrf.mxu1 }
  0xd2   : > { %v713_v0 = vadd.f32 %v693_v54, %v626_v62  ;;  %v1184_v62 = vld [vmem:[#allocation5 + $0x20] sm:$0xff] }
  0xd3   : > { %909 = vmatpush.bf16.msrb.mxu1 %v1184_v62 }
  0xd4   : > { %v725_v3 = vadd.f32 %v1707_v63, %v713_v0 }
  0xd5   : > { %v521_v4 = vpop.f32.mrf.mxu2 }
  0xd6   : > { %v540_v6 = vadd.f32 %v521_v4, %v443_v2  ;;  %v733_v12 = vmax.f32 %v725_v3, 0.0 }
  0xd7   : > { %v613_v24 = vpop.f32.mrf.mxu3  ;;  %910 = vmatpush.bf16.msrb.mxu1 %v1183_v11 }
  0xd8   : > { %v627_v8 = vadd.f32 %v608_v1, %v540_v6  ;;  %v742_v18 = vadd.f32 %v1710_v13, %v733_v12  ;;  %v703_v46 = vpop.f32.mrf.mxu0  ;;  %v453_v6 = vadd.f32 %v452_v22, %v1702_v56 }
  0xda   : > { %v714_v15 = vadd.f32 %v695_v59, %v627_v8  ;;  %v750_v26 = vrot.slane %v742_v18, 4 }
  0xdc   : > { %v726_v17 = vadd.f32 %v1707_v63, %v714_v15  ;;  %v751_v35 = vmax.f32 %v742_v18, %v750_v26 }
  0xdd   : > { %v524_v20 = vpop.f32.mrf.mxu2 }
  0xde   : > { %v734_v21 = vmax.f32 %v726_v17, 0.0  ;;  %v541_v23 = vadd.f32 %v524_v20, %v446_v16  ;;  %v752_v41 = vrot.slane %v751_v35, 2 }
  0xdf   : > { %v616_v42 = vpop.f32.mrf.mxu3 }
  0xe0   : > { %v743_v25 = vadd.f32 %v1710_v13, %v734_v21  ;;  %v628_v9 = vadd.f32 %v611_v5, %v541_v23  ;;  %v753_v52 = vmax.f32 %v751_v35, %v752_v41  ;;  %v705_v16 = vpop.f32.mrf.mxu0  ;;  %v1182_v23 = vld [vmem:[#allocation5 + $0x10] sm:$0xff] }
  0xe1   : > { %911 = vmatpush.bf16.msrb.mxu1 %v1182_v23 }
  0xe2   : > { %v756_v28 = vrot.slane %v743_v25, 4  ;;  %v715_v29 = vadd.f32 %v698_v7, %v628_v9  ;;  %v754_v0 = vrot.slane %v753_v52, 1 }
  0xe4   : > { %v757_v32 = vmax.f32 %v743_v25, %v756_v28  ;;  %v727_v34 = vadd.f32 %v1707_v63, %v715_v29  ;;  %v755_v12 = vmax.f32 %v753_v52, %v754_v0  ;;  %v455_v25 = vpop.f32.mrf.mxu1 }
  0xe5   : > { %v526_v36 = vpop.f32.mrf.mxu2 }
  0xe6   : > { %v735_v37 = vmax.f32 %v727_v34, 0.0  ;;  %v542_v38 = vadd.f32 %v526_v36, %v448_v31  ;;  %v758_v33 = vrot.slane %v757_v32, 2  ;;  %v798_v56 = vpack.c.bf16 %v755_v12, %v755_v12  ;;  %v1181_v31 = vld [vmem:[#allocation5 + $0x8] sm:$0xff] }
  0xe7   : > { %v618_v5 = vpop.f32.mrf.mxu3  ;;  %v456_v34 = vadd.f32 %v455_v25, %v1698_v48  ;;  %912 = vmatpush.bf16.msrb.mxu1 %v1181_v31 }
  0xe8   : > { %v744_v19 = vadd.f32 %v1710_v13, %v735_v37  ;;  %v629_v40 = vadd.f32 %v613_v24, %v542_v38  ;;  %v759_v14 = vmax.f32 %v757_v32, %v758_v33  ;;  %v834_v38 = vunpack.c.l.b16 %v798_v56  ;;  %v708_v45 = vpop.f32.mrf.mxu0 }
  0xea   : > { %v762_v43 = vrot.slane %v744_v19, 4  ;;  %v716_v44 = vadd.f32 %v700_v27, %v629_v40  ;;  %v760_v58 = vrot.slane %v759_v14, 1 }
  0xec   : > { %v763_v49 = vmax.f32 %v744_v19, %v762_v43  ;;  %v728_v51 = vadd.f32 %v1707_v63, %v716_v44  ;;  %v761_v4 = vmax.f32 %v759_v14, %v760_v58  ;;  %v1180_v44 = vld [vmem:[#allocation5] sm:$0xff] }
  0xed   : > { %v529_v54 = vpop.f32.mrf.mxu2  ;;  %913 = vmatpush.bf16.msrb.mxu1 %v1180_v44 }
  0xee   : > { %v764_v55 = vrot.slane %v763_v49, 2  ;;  %v736_v1 = vmax.f32 %v728_v51, 0.0  ;;  %v543_v57 = vadd.f32 %v529_v54, %v451_v47  ;;  %v799_v24 = vpack.c.bf16 %v761_v4, %v761_v4  ;;  %v457_v51 = vpop.f32.mrf.mxu1 }
  0xef   : > { %v621_v33 = vpop.f32.mrf.mxu3 }
  0xf0   : > { %v765_v59 = vmax.f32 %v763_v49, %v764_v55  ;;  %v745_v60 = vadd.f32 %v1710_v13, %v736_v1  ;;  %v630_v61 = vadd.f32 %v616_v42, %v543_v57  ;;  %v835_v32 = vunpack.c.l.b16 %v799_v24 }
  0xf1   : > { %v458_v57 = vadd.f32 %v457_v51, %v1700_v50 }
  0xf2   : > { %v766_v2 = vrot.slane %v765_v59, 1  ;;  %v768_v3 = vrot.slane %v745_v60, 4  ;;  %v717_v53 = vadd.f32 %v703_v46, %v630_v61  ;;  %v843_v14 = vsel %vm842_vm5, %v835_v32, %v834_v38 }
  0xf4   : > { %v769_v7 = vmax.f32 %v745_v60, %v768_v3  ;;  %v729_v8 = vadd.f32 %v1707_v63, %v717_v53  ;;  %v767_v15 = vmax.f32 %v765_v59, %v766_v2 }
  0xf5   : > { %v531_v17 = vpop.f32.mrf.mxu2 }
  0xf6   : > { %v770_v18 = vrot.slane %v769_v7, 2  ;;  %v737_v20 = vmax.f32 %v729_v8, 0.0  ;;  %v544_v21 = vadd.f32 %v531_v17, %v453_v6  ;;  %v800_v27 = vpack.c.bf16 %v767_v15, %v767_v15  ;;  %v710_v8 = vpop.f32.mrf.mxu0 }
  0xf7   : > { %v623_v53 = vpop.f32.mrf.mxu3 }
  0xf8   : > { %v771_v9 = vmax.f32 %v769_v7, %v770_v18  ;;  %v746_v10 = vadd.f32 %v1710_v13, %v737_v20  ;;  %v631_v26 = vadd.f32 %v618_v5, %v544_v21  ;;  %v836_v39 = vunpack.c.l.b16 %v800_v27 }
  0xfa   : > { %v772_v28 = vrot.slane %v771_v9, 1  ;;  %v774_v29 = vrot.slane %v746_v10, 4  ;;  %v718_v30 = vadd.f32 %v705_v16, %v631_v26  ;;  %v845_v52 = vsel %vm844_vm6, %v836_v39, %v843_v14  ;;  %v1255_v39 = vld [vmem:[%s1771_s5] ss:$0 sm:$0xff] }
  0xfc   : > { %v773_v35 = vmax.f32 %v771_v9, %v772_v28  ;;  %v775_v36 = vmax.f32 %v746_v10, %v774_v29  ;;  %v730_v37 = vadd.f32 %v1707_v63, %v718_v30 }
  0xfd   : > { %v534_v19 = vpop.f32.mrf.mxu2 }
  0xfe   : > { %v801_v40 = vpack.c.bf16 %v773_v35, %v773_v35  ;;  %v776_v41 = vrot.slane %v775_v36, 2  ;;  %v738_v42 = vmax.f32 %v730_v37, 0.0  ;;  %v545_v43 = vadd.f32 %v534_v19, %v456_v34 }
 0x100   : > { %v837_v48 = vunpack.c.l.b16 %v801_v40  ;;  %v777_v46 = vmax.f32 %v775_v36, %v776_v41  ;;  %v747_v47 = vadd.f32 %v1710_v13, %v738_v42  ;;  %v632_v49 = vadd.f32 %v621_v33, %v545_v43 }
 0x102   : > { %v778_v22 = vrot.slane %v777_v46, 1  ;;  %v780_v54 = vrot.slane %v747_v47, 4  ;;  %v719_v55 = vadd.f32 %v708_v45, %v632_v49  ;;  %v847_v1 = vsel %vm846_vm7, %v837_v48, %v845_v52 }
 0x104   : > { %v779_v58 = vmax.f32 %v777_v46, %v778_v22  ;;  %v781_v59 = vmax.f32 %v747_v47, %v780_v54  ;;  %v731_v60 = vadd.f32 %v1707_v63, %v719_v55 }
 0x105   : > { %v536_v61 = vpop.f32.mrf.mxu2 }
 0x106   : > { %v802_v62 = vpack.c.bf16 %v779_v58, %v779_v58  ;;  %v782_v0 = vrot.slane %v781_v59, 2  ;;  %v739_v2 = vmax.f32 %v731_v60, 0.0  ;;  %v546_v3 = vadd.f32 %v536_v61, %v458_v57 }
 0x108   : > { %v783_v4 = vmax.f32 %v781_v59, %v782_v0  ;;  %v748_v5 = vadd.f32 %v1710_v13, %v739_v2  ;;  %v633_v6 = vadd.f32 %v623_v53, %v546_v3  ;;  %v838_v7 = vunpack.c.l.b16 %v802_v62 }
 0x10a   : > { %v784_v11 = vrot.slane %v783_v4, 1  ;;  %v786_v12 = vrot.slane %v748_v5, 4  ;;  %v720_v50 = vadd.f32 %v710_v8, %v633_v6  ;;  %v849_v15 = vsel %vm848_vm8, %v838_v7, %v847_v1 }
 0x10c   : > { %v787_v16 = vmax.f32 %v748_v5, %v786_v12  ;;  %v732_v17 = vadd.f32 %v1707_v63, %v720_v50  ;;  %v785_v18 = vmax.f32 %v783_v4, %v784_v11 }
 0x10e   : > { %v788_v20 = vrot.slane %v787_v16, 2  ;;  %v740_v21 = vmax.f32 %v732_v17, 0.0  ;;  %v803_v25 = vpack.c.bf16 %v785_v18, %v785_v18 }
 0x110   : > { %v789_v23 = vmax.f32 %v787_v16, %v788_v20  ;;  %v749_v24 = vadd.f32 %v1710_v13, %v740_v21  ;;  %v839_v27 = vunpack.c.l.b16 %v803_v25 }
 0x112   : > { %v792_v9 = vrot.slane %v749_v24, 4  ;;  %v790_v10 = vrot.slane %v789_v23, 1  ;;  %v851_v32 = vsel %vm850_vm9, %v839_v27, %v849_v15 }
 0x114   : > { %v793_v26 = vmax.f32 %v749_v24, %v792_v9  ;;  %v791_v56 = vmax.f32 %v789_v23, %v790_v10 }
 0x116   : > { %v794_v28 = vrot.slane %v793_v26, 2  ;;  %v804_v29 = vpack.c.bf16 %v791_v56, %v791_v56 }
 0x118   : > { %v795_v30 = vmax.f32 %v793_v26, %v794_v28  ;;  %v840_v31 = vunpack.c.l.b16 %v804_v29 }
 0x11a   : > { %v796_v63 = vrot.slane %v795_v30, 1  ;;  %v853_v34 = vsel %vm852_vm10, %v840_v31, %v851_v32 }
 0x11c   : > { %v797_v35 = vmax.f32 %v795_v30, %v796_v63 }
 0x11e   : > { %v805_v36 = vpack.c.bf16 %v797_v35, %v797_v35 }
 0x120   : > { %v841_v13 = vunpack.c.l.b16 %v805_v36 }
 0x122   : > { %v855_v37 = vsel %vm854_vm11, %v841_v13, %v853_v34 }
 0x123   : > { %v856_v38 = vpack.c.b16 %v855_v37, %v855_v37 }
 0x125   : > { %914 = vmatmul.bf16.vlgmr.msrb.gmra.mxu1 %v856_v38 }
 0x1a2   : > { %v915_v33 = vpop.f32.mrf.mxu1 }
 0x1a3   : > { %v916_v19 = vadd.f32 %v1255_v39, %v915_v33 }
 0x1a5   : > { %919 = vmax.xlane.f32.xlu0 %v916_v19 }
 0x1aa   : > { %v917_v40 = vpop.f32.mrf.mxu1 }
 0x218   : > { %v920_v41 = vpop.xlane.xlu0 %919 }
 0x219   : > { %v921_v42 = vsub.f32 %v916_v19, %v920_v41 }
 0x21b   : > { %v922_v43 = vmul.f32 1.442695, %v921_v42 }
 0x21d   : > { %1256 = vpow2.f32 %v922_v43 }
 0x223   : > { %v1257_v44 = vpop.eup %1256 }
 0x224   : > { %924 = vadd.xlane.f32.xlu0 %v1257_v44 }
 0x297   : > { %v925_v45 = vpop.xlane.xlu0 %924 }
 0x298   : > { %1258 = vlog2.f32 %v925_v45 }
 0x29e   : > { %v1259_v14 = vpop.eup %1258 }
 0x29f   : > { %v927_v48 = vmul.f32 0.6931472, %v1259_v14 }
 0x2a1   : > { %v928_v46 = vsub.f32 %v921_v42, %v927_v48 }
 0x2a3   : > { %929 = vst [vmem:[%s277_s13] sm:$0xff] %v928_v46 }
 0x2a4   : > { %1347 = shalt.err (!%p1344_p8)
}
 0x2a5   : > { %1200 = dma.vmem_to_hbm [thread:$0]  (%p1469_p5), %s944_s14, 128, %s946_s25, %s931_s15  }
 0x2a6 PF: > { %p1217_p9 = scmp.ge.s32.totalorder %s1390_s24, 2  ;;  %s957_s26 = sand.u32 1, %s1378_s21  }
 0x2a7   : > { %s958_s29 = scalar_lea.sflag [#allocation4], %s957_s26 }
 0x2a8   : > { %p1210_p10 = pnand %p1217_p9, %p1473_p6 }
 0x2aa   : > { %p1211_p11 = pneg %p1210_p10 }
 0x2ac   : > { %1373 = dma.done.wait (%p1211_p11), %s958_s29, 128  }
 0x2ad   : > { %1375 = vsyncadd (%p1211_p11), %s958_s29, 4294967168  ;;  %p18_p12 = scmp.ge.s32.totalorder %s1456_s27, 4   ;;  %s1776_s21 = smov %s1382_s22 }
 0x2ae   : > { %s1777_s22 = smov %s1386_s23  ;;  %s1778_s23 = smov %s1467_s30 }
 0x2af   : > { %s1779_s24 = smov %s1456_s27  ;;  %20 = sbr.rel (!%p18_p12) target bundleno = 5 (0x5), region = 92 }
 0x2b4   :  { %964 = vsyncpa [#allocation3], 1 }
 0x2b5   :  { %966 = vsyncpa [#allocation3 + $0x1], 1 }
 0x2b6   :  { %967 = vsyncpa [#allocation6], 1 }
 0x2b7   :  { %968 = vsyncpa [#allocation4], 1 }
 0x2b8   :  { %970 = vsyncpa [#allocation4 + $0x1], 1 }

</bundles_post_ra>
